<compile_context>
chip_gen: v7x
topology: tpu7x:2x2x1
jax: 0.10.0
libtpu: 0.0.40
codegen_flags: <defaults>
</compile_context>

<pallas_src>
import functools

import numpy as np
import jax
import jax.numpy as jnp
from jax.experimental import pallas as pl
from jax.experimental.pallas import tpu as pltpu

LN_EPS = 1e-5  # torch.nn.LayerNorm default
_VMEM_LIMIT = 48 * 1024 * 1024  # above 16/32 MiB scoped defaults, < v7x 64 MiB/TC


def _layer_norm(x, gamma, beta):
    # x: (T, D) f32, gamma/beta: (1, D) f32
    mean = jnp.mean(x, axis=-1, keepdims=True)
    var = jnp.mean((x - mean) ** 2, axis=-1, keepdims=True)
    return (x - mean) * jax.lax.rsqrt(var + LN_EPS) * gamma + beta


def _new_gelu(x):
    c = np.float32(np.sqrt(2.0 / np.pi))
    return 0.5 * x * (1.0 + jnp.tanh(c * (x + 0.044715 * x * x * x)))


# --------------------------- pass 1: LN1 + QKV --------------------------------
def qkv_proj_kernel(x_ref, ln1_w_ref, ln1_b_ref,
                    wq_ref, wk_ref, wv_ref, bq_ref, bk_ref, bv_ref,
                    q_ref, k_ref, v_ref, *, n_heads, scale):
    dh = q_ref.shape[3]
    cd = wq_ref.dtype  # matmul compute dtype (bf16 or f32)

    def split_heads(y2d):  # (tl, D) -> (H, tl, dh); once per row tile only
        return jnp.stack(
            [y2d[:, h * dh:(h + 1) * dh] for h in range(n_heads)], axis=0)

    x = x_ref[0].astype(jnp.float32)
    n1 = _layer_norm(x, ln1_w_ref[...], ln1_b_ref[...]).astype(cd)
    q = jnp.dot(n1, wq_ref[...], preferred_element_type=jnp.float32) + bq_ref[...]
    k = jnp.dot(n1, wk_ref[...], preferred_element_type=jnp.float32) + bk_ref[...]
    v = jnp.dot(n1, wv_ref[...], preferred_element_type=jnp.float32) + bv_ref[...]
    # NOTE: the PyTorch module scales by 1/sqrt(d_model) (d_k is taken BEFORE
    # the head split) -- keep those exact semantics; bake it into Q here.
    q_ref[0] = split_heads(q * scale).astype(q_ref.dtype)
    k_ref[0] = split_heads(k).astype(k_ref.dtype)
    v_ref[0] = split_heads(v).astype(v_ref.dtype)


# ----------------------- pass 2: flash attention ------------------------------
def attn_kernel(q_ref, k_ref, v_ref, o_ref, m_scr, l_scr, acc_scr,
                *, approx_recip):
    qi = pl.program_id(1)
    ki = pl.program_id(2)
    nk = pl.num_programs(2)
    n_heads, tq, dh = q_ref.shape[1], q_ref.shape[2], q_ref.shape[3]
    tk = k_ref.shape[2]
    cd = q_ref.dtype

    @pl.when(ki == 0)
    def _init():
        m_scr[...] = jnp.full(m_scr.shape, -jnp.inf, dtype=m_scr.dtype)
        l_scr[...] = jnp.zeros(l_scr.shape, dtype=l_scr.dtype)
        acc_scr[...] = jnp.zeros(acc_scr.shape, dtype=acc_scr.dtype)

    def process(masked):
        q_h = q_ref[0]                        # (H, tq, dh), pre-scaled
        k_h = k_ref[0]                        # (H, tk, dh)
        v_h = v_ref[0]
        s = jnp.einsum("hqd,hkd->hqk", q_h, k_h,
                       preferred_element_type=jnp.float32)      # (H, tq, tk)
        if masked:
            rows = jax.lax.broadcasted_iota(jnp.int32, (tq, tk), 0) + qi * tq
            cols = jax.lax.broadcasted_iota(jnp.int32, (tq, tk), 1) + ki * tk
            s = jnp.where((cols <= rows)[None, :, :], s, -jnp.inf)
        # Online softmax (f32).  -inf safety: the ki==0 tile is always executed
        # and its column 0 is causally visible to every query row, so m_scr is
        # finite before any fully-masked row of a later diagonal tile appears.
        m_prev = m_scr[...]
        m_new = jnp.maximum(m_prev, jnp.max(s, axis=-1, keepdims=True))
        alpha = jnp.exp(m_prev - m_new)
        p = jnp.exp(s - m_new)
        l_scr[...] = alpha * l_scr[...] + jnp.sum(p, axis=-1, keepdims=True)
        acc_scr[...] = alpha * acc_scr[...] + jnp.einsum(
            "hqk,hkd->hqd", p.astype(cd), v_h,
            preferred_element_type=jnp.float32)
        m_scr[...] = m_new

    needed = ki * tk < (qi + 1) * tq                 # any unmasked column
    fully_unmasked = (ki + 1) * tk - 1 <= qi * tq    # whole tile below diagonal

    @pl.when(fully_unmasked)                          # fast path: no mask math
    def _fast():
        process(masked=False)

    @pl.when(jnp.logical_and(needed, jnp.logical_not(fully_unmasked)))
    def _diagonal():                                  # diagonal tiles only
        process(masked=True)

    @pl.when(ki == nk - 1)
    def _finalize():
        inv_l = pl.reciprocal(l_scr[...], approx=approx_recip)   # EUP
        o = acc_scr[...] * inv_l                                 # (H, tq, dh)
        # head merge happens once per q tile (amortized over all kv steps)
        o2d = jnp.concatenate([o[h] for h in range(n_heads)], axis=-1)
        o_ref[0] = o2d.astype(o_ref.dtype)


# --------------- pass 3: attn proj + residual + LN2 + FFN ---------------------
def ffn_kernel(x_ref, o_ref, wproj_ref, bproj_ref, ln2_w_ref, ln2_b_ref,
               w1_ref, b1_ref, w2_ref, b2_ref, out_ref,
               x1_scr, n2_scr, acc_scr):
    fi = pl.program_id(2)
    nf = pl.num_programs(2)
    cd = w1_ref.dtype

    @pl.when(fi == 0)
    def _init():
        attn = jnp.dot(o_ref[0].astype(cd), wproj_ref[...],
                       preferred_element_type=jnp.float32) + bproj_ref[...]
        x1 = x_ref[0].astype(jnp.float32) + attn            # residual 1
        x1_scr[...] = x1
        n2_scr[...] = _layer_norm(
            x1, ln2_w_ref[...], ln2_b_ref[...]).astype(n2_scr.dtype)
        acc_scr[...] = jnp.zeros(acc_scr.shape, dtype=acc_scr.dtype)

    # one d_middle tile of the FFN per grid step (streamed weights)
    h1 = jnp.dot(n2_scr[...], w1_ref[...],
                 preferred_element_type=jnp.float32) + b1_ref[...]
    h1 = _new_gelu(h1)
    acc_scr[...] += jnp.dot(h1.astype(cd), w2_ref[...],
                            preferred_element_type=jnp.float32)

    @pl.when(fi == nf - 1)
    def _finalize():
        out_ref[0] = (x1_scr[...] + acc_scr[...] + b2_ref[...]).astype(out_ref.dtype)


# ------------------------------- wrapper --------------------------------------
def _pick_tile(length, target):
    if length <= target:
        return length
    t = target
    while t >= 8:
        if length % t == 0:
            return t
        t //= 2
    return length


def _const_spec(shape):
    nd = len(shape)
    return pl.BlockSpec(shape, lambda *_: (0,) * nd)


def decoder_block(x, params, n_heads, *, tq=None, tk=None, tf=None,
                  compute_dtype=jnp.bfloat16):
    B, L, D = x.shape
    assert D % n_heads == 0
    dh = D // n_heads
    d_mid = params["w1"].shape[1]

    tq = _pick_tile(L, 256) if tq is None else tq
    tk = _pick_tile(L, 256) if tk is None else tk
    tf = _pick_tile(d_mid, 512) if tf is None else tf
    assert L % tq == 0 and L % tk == 0 and d_mid % tf == 0
    nq, nk, nf = L // tq, L // tk, d_mid // tf

    cd = jnp.dtype(compute_dtype)
    approx_recip = bool(cd != jnp.dtype(jnp.float32))

    # Host-side split of the fused QKV weight (plain XLA, free) and cast of the
    # big matrices to the matmul compute dtype (halves weight HBM traffic).
    wqkv, bqkv = params["wqkv"], params["bqkv"]
    wq = wqkv[:, :D].astype(cd)
    wk = wqkv[:, D:2 * D].astype(cd)
    wv = wqkv[:, 2 * D:].astype(cd)
    bq, bk, bv = bqkv[:, :D], bqkv[:, D:2 * D], bqkv[:, 2 * D:]
    wproj = params["wproj"].astype(cd)
    w1 = params["w1"].astype(cd)
    w2 = params["w2"].astype(cd)

    # ---- pass 1: LN1 + QKV projection (once per row tile) --------------------
    q, k, v = pl.pallas_call(
        functools.partial(qkv_proj_kernel, n_heads=n_heads,
                          scale=np.float32(1.0 / np.sqrt(D))),
        out_shape=tuple(jax.ShapeDtypeStruct((B, n_heads, L, dh), cd)
                        for _ in range(3)),
        grid_spec=pltpu.PrefetchScalarGridSpec(
            num_scalar_prefetch=0,
            grid=(B, nq),
            in_specs=[
                pl.BlockSpec((1, tq, D), lambda b, i: (b, i, 0)),      # x rows
                _const_spec((1, D)), _const_spec((1, D)),              # ln1 w, b
                _const_spec((D, D)), _const_spec((D, D)), _const_spec((D, D)),
                _const_spec((1, D)), _const_spec((1, D)), _const_spec((1, D)),
            ],
            out_specs=tuple(
                pl.BlockSpec((1, n_heads, tq, dh), lambda b, i: (b, 0, i, 0))
                for _ in range(3)),
        ),
        compiler_params=pltpu.CompilerParams(
            dimension_semantics=("parallel", "parallel"),
            vmem_limit_bytes=_VMEM_LIMIT),
    )(x, params["ln1_w"], params["ln1_b"], wq, wk, wv, bq, bk, bv)

    # ---- pass 2: flash attention over kv tiles --------------------------------
    def kv_index_map(b, qi, ki):
        # Clamp so kv tiles entirely above the causal diagonal (which the
        # kernel skips) re-use the previous block index -> their DMA is elided.
        last_needed = ((qi + 1) * tq - 1) // tk
        return (b, 0, jnp.minimum(ki, last_needed), 0)

    o = pl.pallas_call(
        functools.partial(attn_kernel, approx_recip=approx_recip),
        out_shape=jax.ShapeDtypeStruct((B, L, D), cd),
        grid_spec=pltpu.PrefetchScalarGridSpec(
            num_scalar_prefetch=0,
            grid=(B, nq, nk),
            in_specs=[
                pl.BlockSpec((1, n_heads, tq, dh),
                             lambda b, qi, ki: (b, 0, qi, 0)),          # Q
                pl.BlockSpec((1, n_heads, tk, dh), kv_index_map),       # K
                pl.BlockSpec((1, n_heads, tk, dh), kv_index_map),       # V
            ],
            out_specs=pl.BlockSpec((1, tq, D), lambda b, qi, ki: (b, qi, 0)),
            scratch_shapes=[
                pltpu.VMEM((n_heads, tq, 1), jnp.float32),   # running max
                pltpu.VMEM((n_heads, tq, 1), jnp.float32),   # running denom
                pltpu.VMEM((n_heads, tq, dh), jnp.float32),  # output accumulator
            ],
        ),
        compiler_params=pltpu.CompilerParams(
            dimension_semantics=("parallel", "parallel", "arbitrary"),
            vmem_limit_bytes=_VMEM_LIMIT),
    )(q, k, v)

    # ---- pass 3: attn proj + residual + LN2 + FFN + residual ------------------
    out = pl.pallas_call(
        ffn_kernel,
        out_shape=jax.ShapeDtypeStruct((B, L, D), x.dtype),
        grid_spec=pltpu.PrefetchScalarGridSpec(
            num_scalar_prefetch=0,
            grid=(B, nq, nf),
            in_specs=[
                pl.BlockSpec((1, tq, D), lambda b, i, fi: (b, i, 0)),   # x (residual)
                pl.BlockSpec((1, tq, D), lambda b, i, fi: (b, i, 0)),   # attention out
                _const_spec((D, D)), _const_spec((1, D)),               # wproj, bproj
                _const_spec((1, D)), _const_spec((1, D)),               # ln2 w, b
                pl.BlockSpec((D, tf), lambda b, i, fi: (0, fi)),        # w1 tile
                pl.BlockSpec((1, tf), lambda b, i, fi: (0, fi)),        # b1 tile
                pl.BlockSpec((tf, D), lambda b, i, fi: (fi, 0)),        # w2 tile
                _const_spec((1, D)),                                    # b2
            ],
            out_specs=pl.BlockSpec((1, tq, D), lambda b, i, fi: (b, i, 0)),
            scratch_shapes=[
                pltpu.VMEM((tq, D), jnp.float32),   # x + attn (residual 1)
                pltpu.VMEM((tq, D), cd),            # LN2(x1) in compute dtype
                pltpu.VMEM((tq, D), jnp.float32),   # FFN accumulator
            ],
        ),
        compiler_params=pltpu.CompilerParams(
            dimension_semantics=("parallel", "parallel", "arbitrary"),
            vmem_limit_bytes=_VMEM_LIMIT),
    )(x, o, wproj, params["bproj"], params["ln2_w"], params["ln2_b"],
      w1, params["b1"], w2, params["b2"])
    return out


# ---------------- pure-JAX reference for validation --------------------------
def reference_decoder_block(x, p, n_heads):
    B, L, D = x.shape
    dh = D // n_heads

    def ln(v, g, b):
        m = v.mean(-1, keepdims=True)
        var = ((v - m) ** 2).mean(-1, keepdims=True)
        return (v - m) / jnp.sqrt(var + LN_EPS) * g + b

    n1 = ln(x, p["ln1_w"], p["ln1_b"])
    qkv = n1 @ p["wqkv"] + p["bqkv"]
    q, k, v = jnp.split(qkv, 3, axis=-1)
    q = q.reshape(B, L, n_heads, dh).transpose(0, 2, 1, 3)
    k = k.reshape(B, L, n_heads, dh).transpose(0, 2, 1, 3)
    v = v.reshape(B, L, n_heads, dh).transpose(0, 2, 1, 3)
    scores = jnp.einsum("bhld,bhmd->bhlm", q, k) / np.sqrt(D)
    mask = jnp.tril(jnp.ones((L, L), bool))
    scores = jnp.where(mask, scores, -jnp.inf)
    attn = jax.nn.softmax(scores, axis=-1)
    o = jnp.einsum("bhlm,bhmd->bhld", attn, v)
    o = o.transpose(0, 2, 1, 3).reshape(B, L, D)
    x = x + (o @ p["wproj"] + p["bproj"])
    n2 = ln(x, p["ln2_w"], p["ln2_b"])
    h1 = n2 @ p["w1"] + p["b1"]
    c = np.sqrt(2.0 / np.pi)
    h1 = 0.5 * h1 * (1.0 + jnp.tanh(c * (h1 + 0.044715 * h1 ** 3)))
    return x + (h1 @ p["w2"] + p["b2"])


def _make_params(key, d_model, d_middle):
    ks = jax.random.split(key, 8)
    init = lambda k, s: (0.05 * jax.random.normal(k, s)).astype(jnp.float32)
    return {
        "ln1_w": jnp.ones((1, d_model), jnp.float32),
        "ln1_b": jnp.zeros((1, d_model), jnp.float32),
        "wqkv": init(ks[0], (d_model, 3 * d_model)),
        "bqkv": init(ks[1], (1, 3 * d_model)),
        "wproj": init(ks[2], (d_model, d_model)),
        "bproj": init(ks[3], (1, d_model)),
        "ln2_w": jnp.ones((1, d_model), jnp.float32),
        "ln2_b": jnp.zeros((1, d_model), jnp.float32),
        "w1": init(ks[4], (d_model, d_middle)),
        "b1": init(ks[5], (1, d_middle)),
        "w2": init(ks[6], (d_middle, d_model)),
        "b2": init(ks[7], (1, d_model)),
    }


if __name__ == "__main__":
    key = jax.random.PRNGKey(0)

    # --- config 1: tiny shapes from the module (single tile, f32 path) -------
    B, L, d_model, d_middle, H = 2, 8, 32, 64, 4
    k_p, k_x, key = jax.random.split(key, 3)
    params = _make_params(k_p, d_model, d_middle)
    x = jax.random.normal(k_x, (B, L, d_model), jnp.float32)

    ref = reference_decoder_block(x, params, H)
    out = jax.block_until_ready(
        decoder_block(x, params, H, compute_dtype=jnp.float32))
    np.testing.assert_allclose(np.asarray(out), np.asarray(ref),
                               rtol=1e-4, atol=1e-4)

    # --- config 2: tiled sequence — exercises the fully-unmasked fast path,
    #     the diagonal masked path and the clamped (DMA-elided) skipped tile ---
    B, L, d_model, d_middle, H = 2, 256, 128, 256, 4
    k_p, k_x, key = jax.random.split(key, 3)
    params = _make_params(k_p, d_model, d_middle)
    x = jax.random.normal(k_x, (B, L, d_model), jnp.float32)
    ref = reference_decoder_block(x, params, H)

    out_f32 = jax.block_until_ready(
        decoder_block(x, params, H, tq=128, tk=128,
                      compute_dtype=jnp.float32))
    np.testing.assert_allclose(np.asarray(out_f32), np.asarray(ref),
                               rtol=1e-4, atol=1e-4)

    out_bf16 = jax.block_until_ready(
        decoder_block(x, params, H, tq=128, tk=128,
                      compute_dtype=jnp.bfloat16))
    np.testing.assert_allclose(np.asarray(out_bf16), np.asarray(ref),
                               rtol=5e-2, atol=5e-2)

    print("KERNEL_OK")
</pallas_src>

<mosaic_0001>
module attributes {stable_mosaic.version = 11 : i64} {
  func.func @qkv_proj_kernel(%arg0: i32, %arg1: i32, %arg2: memref<1x8x32xf32, #tpu.memory_space<vmem>>, %arg3: memref<1x32xf32, #tpu.memory_space<vmem>>, %arg4: memref<1x32xf32, #tpu.memory_space<vmem>>, %arg5: memref<32x32xf32, #tpu.memory_space<vmem>>, %arg6: memref<32x32xf32, #tpu.memory_space<vmem>>, %arg7: memref<32x32xf32, #tpu.memory_space<vmem>>, %arg8: memref<1x32xf32, #tpu.memory_space<vmem>>, %arg9: memref<1x32xf32, #tpu.memory_space<vmem>>, %arg10: memref<1x32xf32, #tpu.memory_space<vmem>>, %arg11: memref<1x4x8x8xf32, #tpu.memory_space<vmem>>, %arg12: memref<1x4x8x8xf32, #tpu.memory_space<vmem>>, %arg13: memref<1x4x8x8xf32, #tpu.memory_space<vmem>>) attributes {dimension_semantics = [#tpu.dimension_semantics<parallel>, #tpu.dimension_semantics<parallel>], iteration_bounds = array<i64: 2, 1>, scalar_prefetch = 0 : i64, scratch_operands = 0 : i64, tpu.core_type = #tpu.core_type<tc>, window_params = [{transform_indices = @transform_0, window_bounds = array<i64: 1, 8, 32>}, {pipeline_mode = #tpu.pipeline_mode<synchronous>, transform_indices = @transform_1, window_bounds = array<i64: 1, 32>}, {pipeline_mode = #tpu.pipeline_mode<synchronous>, transform_indices = @transform_2, window_bounds = array<i64: 1, 32>}, {pipeline_mode = #tpu.pipeline_mode<synchronous>, transform_indices = @transform_3, window_bounds = array<i64: 32, 32>}, {pipeline_mode = #tpu.pipeline_mode<synchronous>, transform_indices = @transform_4, window_bounds = array<i64: 32, 32>}, {pipeline_mode = #tpu.pipeline_mode<synchronous>, transform_indices = @transform_5, window_bounds = array<i64: 32, 32>}, {pipeline_mode = #tpu.pipeline_mode<synchronous>, transform_indices = @transform_6, window_bounds = array<i64: 1, 32>}, {pipeline_mode = #tpu.pipeline_mode<synchronous>, transform_indices = @transform_7, window_bounds = array<i64: 1, 32>}, {pipeline_mode = #tpu.pipeline_mode<synchronous>, transform_indices = @transform_8, window_bounds = array<i64: 1, 32>}, {transform_indices = @transform_9, window_bounds = array<i64: 1, 4, 8, 8>}, {transform_indices = @transform_10, window_bounds = array<i64: 1, 4, 8, 8>}, {transform_indices = @transform_11, window_bounds = array<i64: 1, 4, 8, 8>}]} {
    %c0 = arith.constant 0 : index
    %c0_0 = arith.constant 0 : index
    %c0_1 = arith.constant 0 : index
    %0 = vector.load %arg2[%c0, %c0_0, %c0_1] : memref<1x8x32xf32, #tpu.memory_space<vmem>>, vector<1x8x32xf32>
    %1 = vector.shape_cast %0 : vector<1x8x32xf32> to vector<8x32xf32>
    %c0_2 = arith.constant 0 : index
    %c0_3 = arith.constant 0 : index
    %2 = vector.load %arg3[%c0_2, %c0_3] : memref<1x32xf32, #tpu.memory_space<vmem>>, vector<1x32xf32>
    %c0_4 = arith.constant 0 : index
    %c0_5 = arith.constant 0 : index
    %3 = vector.load %arg4[%c0_4, %c0_5] : memref<1x32xf32, #tpu.memory_space<vmem>>, vector<1x32xf32>
    %cst = arith.constant dense<0.000000e+00> : vector<8xf32>
    %4 = vector.multi_reduction <add>, %1, %cst [1] : vector<8x32xf32> to vector<8xf32>
    %5 = vector.shape_cast %4 : vector<8xf32> to vector<8x1xf32>
    %cst_6 = arith.constant 3.200000e+01 : f32
    %6 = vector.broadcast %cst_6 : f32 to vector<8x1xf32>
    %7 = arith.divf %5, %6 : vector<8x1xf32>
    %8 = vector.broadcast %7 : vector<8x1xf32> to vector<8x32xf32>
    %9 = arith.subf %1, %8 : vector<8x32xf32>
    %10 = arith.mulf %9, %9 : vector<8x32xf32>
    %cst_7 = arith.constant dense<0.000000e+00> : vector<8xf32>
    %11 = vector.multi_reduction <add>, %10, %cst_7 [1] : vector<8x32xf32> to vector<8xf32>
    %12 = vector.shape_cast %11 : vector<8xf32> to vector<8x1xf32>
    %cst_8 = arith.constant 3.200000e+01 : f32
    %13 = vector.broadcast %cst_8 : f32 to vector<8x1xf32>
    %14 = arith.divf %12, %13 : vector<8x1xf32>
    %15 = vector.broadcast %7 : vector<8x1xf32> to vector<8x32xf32>
    %16 = arith.subf %1, %15 : vector<8x32xf32>
    %cst_9 = arith.constant 9.99999974E-6 : f32
    %17 = vector.broadcast %cst_9 : f32 to vector<8x1xf32>
    %18 = arith.addf %14, %17 : vector<8x1xf32>
    %19 = math.rsqrt %18 : vector<8x1xf32>
    %20 = vector.broadcast %19 : vector<8x1xf32> to vector<8x32xf32>
    %21 = arith.mulf %16, %20 : vector<8x32xf32>
    %22 = vector.broadcast %2 : vector<1x32xf32> to vector<8x32xf32>
    %23 = arith.mulf %21, %22 : vector<8x32xf32>
    %24 = vector.broadcast %3 : vector<1x32xf32> to vector<8x32xf32>
    %25 = arith.addf %23, %24 : vector<8x32xf32>
    %c0_10 = arith.constant 0 : index
    %c0_11 = arith.constant 0 : index
    %26 = vector.load %arg5[%c0_10, %c0_11] : memref<32x32xf32, #tpu.memory_space<vmem>>, vector<32x32xf32>
    %cst_12 = arith.constant dense<0.000000e+00> : vector<8x32xf32>
    %27 = tpu.matmul %25, %26, %cst_12 {dimension_numbers = #tpu.dot_dimension_numbers<[1], [0], [0], [1], [0, 0, 1, 1], [], []>} : vector<8x32xf32>, vector<32x32xf32>, vector<8x32xf32> -> vector<8x32xf32>
    %c0_13 = arith.constant 0 : index
    %c0_14 = arith.constant 0 : index
    %28 = vector.load %arg8[%c0_13, %c0_14] : memref<1x32xf32, #tpu.memory_space<vmem>>, vector<1x32xf32>
    %29 = vector.broadcast %28 : vector<1x32xf32> to vector<8x32xf32>
    %30 = arith.addf %27, %29 : vector<8x32xf32>
    %c0_15 = arith.constant 0 : index
    %c0_16 = arith.constant 0 : index
    %31 = vector.load %arg6[%c0_15, %c0_16] : memref<32x32xf32, #tpu.memory_space<vmem>>, vector<32x32xf32>
    %cst_17 = arith.constant dense<0.000000e+00> : vector<8x32xf32>
    %32 = tpu.matmul %25, %31, %cst_17 {dimension_numbers = #tpu.dot_dimension_numbers<[1], [0], [0], [1], [0, 0, 1, 1], [], []>} : vector<8x32xf32>, vector<32x32xf32>, vector<8x32xf32> -> vector<8x32xf32>
    %c0_18 = arith.constant 0 : index
    %c0_19 = arith.constant 0 : index
    %33 = vector.load %arg9[%c0_18, %c0_19] : memref<1x32xf32, #tpu.memory_space<vmem>>, vector<1x32xf32>
    %34 = vector.broadcast %33 : vector<1x32xf32> to vector<8x32xf32>
    %35 = arith.addf %32, %34 : vector<8x32xf32>
    %c0_20 = arith.constant 0 : index
    %c0_21 = arith.constant 0 : index
    %36 = vector.load %arg7[%c0_20, %c0_21] : memref<32x32xf32, #tpu.memory_space<vmem>>, vector<32x32xf32>
    %cst_22 = arith.constant dense<0.000000e+00> : vector<8x32xf32>
    %37 = tpu.matmul %25, %36, %cst_22 {dimension_numbers = #tpu.dot_dimension_numbers<[1], [0], [0], [1], [0, 0, 1, 1], [], []>} : vector<8x32xf32>, vector<32x32xf32>, vector<8x32xf32> -> vector<8x32xf32>
    %c0_23 = arith.constant 0 : index
    %c0_24 = arith.constant 0 : index
    %38 = vector.load %arg10[%c0_23, %c0_24] : memref<1x32xf32, #tpu.memory_space<vmem>>, vector<1x32xf32>
    %39 = vector.broadcast %38 : vector<1x32xf32> to vector<8x32xf32>
    %40 = arith.addf %37, %39 : vector<8x32xf32>
    %cst_25 = arith.constant 0.176776692 : f32
    %41 = vector.broadcast %cst_25 : f32 to vector<8x32xf32>
    %42 = arith.mulf %30, %41 : vector<8x32xf32>
    %43 = vector.extract_strided_slice %42 {offsets = [0, 0], sizes = [8, 8], strides = [1, 1]} : vector<8x32xf32> to vector<8x8xf32>
    %44 = vector.extract_strided_slice %42 {offsets = [0, 8], sizes = [8, 8], strides = [1, 1]} : vector<8x32xf32> to vector<8x8xf32>
    %45 = vector.extract_strided_slice %42 {offsets = [0, 16], sizes = [8, 8], strides = [1, 1]} : vector<8x32xf32> to vector<8x8xf32>
    %46 = vector.extract_strided_slice %42 {offsets = [0, 24], sizes = [8, 8], strides = [1, 1]} : vector<8x32xf32> to vector<8x8xf32>
    %47 = vector.shape_cast %43 : vector<8x8xf32> to vector<1x8x8xf32>
    %48 = vector.shape_cast %44 : vector<8x8xf32> to vector<1x8x8xf32>
    %49 = vector.shape_cast %45 : vector<8x8xf32> to vector<1x8x8xf32>
    %50 = vector.shape_cast %46 : vector<8x8xf32> to vector<1x8x8xf32>
    %51 = tpu.concatenate %47, %48, %49, %50 in 0 : vector<1x8x8xf32>, vector<1x8x8xf32>, vector<1x8x8xf32>, vector<1x8x8xf32> -> vector<4x8x8xf32>
    %c0_26 = arith.constant 0 : index
    %c0_27 = arith.constant 0 : index
    %c0_28 = arith.constant 0 : index
    %c0_29 = arith.constant 0 : index
    %52 = vector.load %arg11[%c0_26, %c0_27, %c0_28, %c0_29] : memref<1x4x8x8xf32, #tpu.memory_space<vmem>>, vector<1x4x8x8xf32>
    %53 = vector.shape_cast %52 : vector<1x4x8x8xf32> to vector<4x8x8xf32>
    %54 = vector.shape_cast %51 : vector<4x8x8xf32> to vector<1x4x8x8xf32>
    tpu.vector_store %arg11[%c0_26, %c0_27, %c0_28, %c0_29], %54 {strides = array<i32>} : memref<1x4x8x8xf32, #tpu.memory_space<vmem>>, vector<1x4x8x8xf32>,
    %55 = vector.extract_strided_slice %35 {offsets = [0, 0], sizes = [8, 8], strides = [1, 1]} : vector<8x32xf32> to vector<8x8xf32>
    %56 = vector.extract_strided_slice %35 {offsets = [0, 8], sizes = [8, 8], strides = [1, 1]} : vector<8x32xf32> to vector<8x8xf32>
    %57 = vector.extract_strided_slice %35 {offsets = [0, 16], sizes = [8, 8], strides = [1, 1]} : vector<8x32xf32> to vector<8x8xf32>
    %58 = vector.extract_strided_slice %35 {offsets = [0, 24], sizes = [8, 8], strides = [1, 1]} : vector<8x32xf32> to vector<8x8xf32>
    %59 = vector.shape_cast %55 : vector<8x8xf32> to vector<1x8x8xf32>
    %60 = vector.shape_cast %56 : vector<8x8xf32> to vector<1x8x8xf32>
    %61 = vector.shape_cast %57 : vector<8x8xf32> to vector<1x8x8xf32>
    %62 = vector.shape_cast %58 : vector<8x8xf32> to vector<1x8x8xf32>
    %63 = tpu.concatenate %59, %60, %61, %62 in 0 : vector<1x8x8xf32>, vector<1x8x8xf32>, vector<1x8x8xf32>, vector<1x8x8xf32> -> vector<4x8x8xf32>
    %c0_30 = arith.constant 0 : index
    %c0_31 = arith.constant 0 : index
    %c0_32 = arith.constant 0 : index
    %c0_33 = arith.constant 0 : index
    %64 = vector.load %arg12[%c0_30, %c0_31, %c0_32, %c0_33] : memref<1x4x8x8xf32, #tpu.memory_space<vmem>>, vector<1x4x8x8xf32>
    %65 = vector.shape_cast %64 : vector<1x4x8x8xf32> to vector<4x8x8xf32>
    %66 = vector.shape_cast %63 : vector<4x8x8xf32> to vector<1x4x8x8xf32>
    tpu.vector_store %arg12[%c0_30, %c0_31, %c0_32, %c0_33], %66 {strides = array<i32>} : memref<1x4x8x8xf32, #tpu.memory_space<vmem>>, vector<1x4x8x8xf32>,
    %67 = vector.extract_strided_slice %40 {offsets = [0, 0], sizes = [8, 8], strides = [1, 1]} : vector<8x32xf32> to vector<8x8xf32>
    %68 = vector.extract_strided_slice %40 {offsets = [0, 8], sizes = [8, 8], strides = [1, 1]} : vector<8x32xf32> to vector<8x8xf32>
    %69 = vector.extract_strided_slice %40 {offsets = [0, 16], sizes = [8, 8], strides = [1, 1]} : vector<8x32xf32> to vector<8x8xf32>
    %70 = vector.extract_strided_slice %40 {offsets = [0, 24], sizes = [8, 8], strides = [1, 1]} : vector<8x32xf32> to vector<8x8xf32>
    %71 = vector.shape_cast %67 : vector<8x8xf32> to vector<1x8x8xf32>
    %72 = vector.shape_cast %68 : vector<8x8xf32> to vector<1x8x8xf32>
    %73 = vector.shape_cast %69 : vector<8x8xf32> to vector<1x8x8xf32>
    %74 = vector.shape_cast %70 : vector<8x8xf32> to vector<1x8x8xf32>
    %75 = tpu.concatenate %71, %72, %73, %74 in 0 : vector<1x8x8xf32>, vector<1x8x8xf32>, vector<1x8x8xf32>, vector<1x8x8xf32> -> vector<4x8x8xf32>
    %c0_34 = arith.constant 0 : index
    %c0_35 = arith.constant 0 : index
    %c0_36 = arith.constant 0 : index
    %c0_37 = arith.constant 0 : index
    %76 = vector.load %arg13[%c0_34, %c0_35, %c0_36, %c0_37] : memref<1x4x8x8xf32, #tpu.memory_space<vmem>>, vector<1x4x8x8xf32>
    %77 = vector.shape_cast %76 : vector<1x4x8x8xf32> to vector<4x8x8xf32>
    %78 = vector.shape_cast %75 : vector<4x8x8xf32> to vector<1x4x8x8xf32>
    tpu.vector_store %arg13[%c0_34, %c0_35, %c0_36, %c0_37], %78 {strides = array<i32>} : memref<1x4x8x8xf32, #tpu.memory_space<vmem>>, vector<1x4x8x8xf32>,
    return
  }
  func.func @transform_0(%arg0: i32, %arg1: i32) -> (i32, i32, i32) {
    %c0_i32 = arith.constant 0 : i32
    %c0_i32_0 = arith.constant 0 : i32
    return %arg0, %arg1, %c0_i32 : i32, i32, i32
  }
  func.func @transform_1(%arg0: i32, %arg1: i32) -> (i32, i32) {
    %c0_i32 = arith.constant 0 : i32
    %c0_i32_0 = arith.constant 0 : i32
    %c0_i32_1 = arith.constant 0 : i32
    return %c0_i32, %c0_i32_0 : i32, i32
  }
  func.func @transform_2(%arg0: i32, %arg1: i32) -> (i32, i32) {
    %c0_i32 = arith.constant 0 : i32
    %c0_i32_0 = arith.constant 0 : i32
    %c0_i32_1 = arith.constant 0 : i32
    return %c0_i32, %c0_i32_0 : i32, i32
  }
  func.func @transform_3(%arg0: i32, %arg1: i32) -> (i32, i32) {
    %c0_i32 = arith.constant 0 : i32
    %c0_i32_0 = arith.constant 0 : i32
    %c0_i32_1 = arith.constant 0 : i32
    return %c0_i32, %c0_i32_0 : i32, i32
  }
  func.func @transform_4(%arg0: i32, %arg1: i32) -> (i32, i32) {
    %c0_i32 = arith.constant 0 : i32
    %c0_i32_0 = arith.constant 0 : i32
    %c0_i32_1 = arith.constant 0 : i32
    return %c0_i32, %c0_i32_0 : i32, i32
  }
  func.func @transform_5(%arg0: i32, %arg1: i32) -> (i32, i32) {
    %c0_i32 = arith.constant 0 : i32
    %c0_i32_0 = arith.constant 0 : i32
    %c0_i32_1 = arith.constant 0 : i32
    return %c0_i32, %c0_i32_0 : i32, i32
  }
  func.func @transform_6(%arg0: i32, %arg1: i32) -> (i32, i32) {
    %c0_i32 = arith.constant 0 : i32
    %c0_i32_0 = arith.constant 0 : i32
    %c0_i32_1 = arith.constant 0 : i32
    return %c0_i32, %c0_i32_0 : i32, i32
  }
  func.func @transform_7(%arg0: i32, %arg1: i32) -> (i32, i32) {
    %c0_i32 = arith.constant 0 : i32
    %c0_i32_0 = arith.constant 0 : i32
    %c0_i32_1 = arith.constant 0 : i32
    return %c0_i32, %c0_i32_0 : i32, i32
  }
  func.func @transform_8(%arg0: i32, %arg1: i32) -> (i32, i32) {
    %c0_i32 = arith.constant 0 : i32
    %c0_i32_0 = arith.constant 0 : i32
    %c0_i32_1 = arith.constant 0 : i32
    return %c0_i32, %c0_i32_0 : i32, i32
  }
  func.func @transform_9(%arg0: i32, %arg1: i32) -> (i32, i32, i32, i32) {
    %c0_i32 = arith.constant 0 : i32
    %c0_i32_0 = arith.constant 0 : i32
    %c0_i32_1 = arith.constant 0 : i32
    return %arg0, %c0_i32, %arg1, %c0_i32_0 : i32, i32, i32, i32
  }
  func.func @transform_10(%arg0: i32, %arg1: i32) -> (i32, i32, i32, i32) {
    %c0_i32 = arith.constant 0 : i32
    %c0_i32_0 = arith.constant 0 : i32
    %c0_i32_1 = arith.constant 0 : i32
    return %arg0, %c0_i32, %arg1, %c0_i32_0 : i32, i32, i32, i32
  }
  func.func @transform_11(%arg0: i32, %arg1: i32) -> (i32, i32, i32, i32) {
    %c0_i32 = arith.constant 0 : i32
    %c0_i32_0 = arith.constant 0 : i32
    %c0_i32_1 = arith.constant 0 : i32
    return %arg0, %c0_i32, %arg1, %c0_i32_0 : i32, i32, i32, i32
  }
}

</mosaic_0001>

<bundles_post_ra>
// kernel: tpu_custom_call.1
= control target key start
LH: loop header
LB: loop body
LE: loop exit
PB: predicated region body
PF: predicated region fallthrough
CT: control target
= control target key end

     0   :  { %s2025_s0 = inlined_call_operand.hbm [shape: f32[2,8,32], index: 0, kind: input, shape index: {}]   ;;  %s2026_s1 = inlined_call_operand.vmem [shape: f32[1,32], index: 1, kind: input, shape index: {}]   ;;  %s2027_s2 = inlined_call_operand.vmem [shape: f32[1,32], index: 2, kind: input, shape index: {}]   ;;  %s2028_s3 = inlined_call_operand.hbm [shape: f32[32,32], index: 3, kind: input, shape index: {}]   ;;  %s2029_s4 = inlined_call_operand.hbm [shape: f32[32,32], index: 4, kind: input, shape index: {}]   ;;  %s2030_s5 = inlined_call_operand.hbm [shape: f32[32,32], index: 5, kind: input, shape index: {}]   ;;  %s2031_s6 = inlined_call_operand.vmem [shape: f32[1,32], index: 6, kind: input, shape index: {}]   ;;  %s2032_s7 = inlined_call_operand.vmem [shape: f32[1,32], index: 7, kind: input, shape index: {}]   ;;  %s2033_s8 = inlined_call_operand.vmem [shape: f32[1,32], index: 8, kind: input, shape index: {}]   ;;  %s2034_s9 = inlined_call_operand.hbm [shape: f32[2,4,8,8], index: 9, kind: output, shape index: {0}]   ;;  %s2035_s10 = inlined_call_operand.hbm [shape: f32[2,4,8,8], index: 10, kind: output, shape index: {1}]   ;;  %s2036_s11 = inlined_call_operand.hbm [shape: f32[2,4,8,8], index: 11, kind: output, shape index: {2}]  }
   0x1   :  { %2050 = sst [smem:[#allocation22_spill]] %s2025_s0 }
   0x2   :  { %2051 = sst [smem:[#allocation23_spill]] %s2033_s8 }
   0x3   :  { %2052 = sst [smem:[#allocation24_spill]] %s2034_s9 }
   0x4   :  { %2053 = sst [smem:[#allocation25_spill]] %s2035_s10 }
   0x5   :  { %2054 = sst [smem:[#allocation26_spill]] %s2036_s11 }
   0x6   :  { %17 = vsyncpa [#allocation3], 0 }
   0x7   :  { %19 = vsyncpa [#allocation3 + $0x1], 0 }
   0x8   :  { %20 = vsyncpa [#allocation6], 0 }
   0x9   :  { %21 = vsyncpa [#allocation9], 0 }
   0xa   :  { %22 = vsyncpa [#allocation4], 0 }
   0xb   :  { %24 = vsyncpa [#allocation4 + $0x1], 0 }
   0xc   :  { %25 = vsyncpa [#allocation12], 0 }
   0xd   :  { %27 = vsyncpa [#allocation12 + $0x1], 0  ;;  %s1607_s17 = smov 0   ;;  %s1609_s18 = smov 0  }
   0xe   :  { %s1611_s19 = smov 0   ;;  %s1613_s20 = smov 0  }
   0xf   :  { %s1615_s21 = smov 0   ;;  %s1617_s22 = smov 0  }
  0x10 LB: > { %2055 = sst [smem:[#allocation19_spill]] %s1508_s17  ;;  %s1638_s23 = sadd.s32 4294967295, %s1528_s22   ;;  %s1528_s22 = sphi %s1617_s22, %s33_s22   ;;  %s1524_s21 = sphi %s1615_s21, %s2090_s21   ;;  %s1520_s20 = sphi %s1613_s20, %s2089_s20   ;;  %s1516_s19 = sphi %s1611_s19, %s2088_s19   ;;  %s1512_s18 = sphi %s1609_s18, %s2087_s18   ;;  %s1508_s17 = sphi %s1607_s17, %s2086_s17  }
  0x11   : > { %2056 = sst [smem:[#allocation20_spill]] %s1520_s20  ;;  %s2037_s24 = sadd.s32 4294967294, %s1528_s22  }
  0x12   : > { %p67_p0 = scmp.ne.s32.totalorder %s1512_s18, %s1508_s17  ;;  %p2041_p1 = scmp.eq.s32.totalorder %s1638_s23, 0 }
  0x13   : > { %p267_p3 = scmp.eq.s32.totalorder %s2037_s24, 1  ;;  %p1046_p5 = scmp.ge.s32.totalorder %s1528_s22, 1 }
  0x14   : > { %p1649_p4 = por %p2041_p1, %p67_p0  ;;  %p330_p7 = scmp.lt.s32.totalorder %s1528_s22, 3 }
  0x15   : > { %p1654_p6 = por %p267_p3, %p67_p0  ;;  %s1530_s28 = smov [#allocation5]  }
  0x16   : > { %s2057_s25 = scalar_select %p1649_p4, 1, 0 }
  0x17   : > { %s2058_s26 = scalar_select %p1654_p6, 1, 0 }
  0x18   : > { %p1659_p8 = pnand %p1046_p5, %p330_p7  ;;  %s348_s29 = sshll.u32 %s1530_s28, 4  ;;  %s1663_s29 = int_to_ptr.vmem [resolvable:$true] %s348_s29 }
  0x19   : > { %2059 = sst [smem:[#allocation21_spill]] %s2058_s26  ;;  %s1531_s12 = smov [#allocation7]  }
  0x1a   : > { %s2060_s27 = scalar_select %p1659_p8, 1, 0 }
  0x1b   : > { %p1169_p9 = pneg %p1659_p8  ;;  %s361_s13 = sshll.u32 %s1531_s12, 4  ;;  %s1674_s13 = int_to_ptr.vmem [resolvable:$true] %s361_s13 }
  0x1c   : > { %s1532_s14 = smov [#allocation8]   ;;  %s1264_s24 = scalar_lea.hbm %s2028_s3, 512 }
  0x1d   : > { %p1670_p11 = pnand %p1169_p9, %p2041_p1  ;;  %s1676_s15 = sshll.u32 %s1532_s14, 4  ;;  %s375_s15 = int_to_ptr.vmem [resolvable:$true] %s1676_s15 }
  0x1e   : > { %p1265_p12 = scmp.ne.s32.totalorder %s2028_s3, %s1264_s24  ;;  %p1271_p5 = scmp.lt.u32.totalorder %s1264_s24, %s2028_s3 }
  0x1f   : > { %p1686_p13 = pneg %p1670_p11 }
  0x21   : > { %p1267_p0 = pnand %p1686_p13, %p1265_p12 }
  0x23   : > { %p1268_p3 = pneg %p1267_p0 }
  0x25   : > { %p1273_p7 = pnand %p1271_p5, %p1268_p3 }
  0x27   : > { %1276 = shalt.err (!%p1273_p7)
}
  0x28   : > { %s1277_s17 = scalar_lea.vmem %s1663_s29, 512  ;;  %p1285_p2 = scmp.lt.s32.totalorder %s1663_s29, %s1663_s29 }
  0x29   : > { %p1278_p9 = scmp.ne.s32.totalorder %s1663_s29, %s1277_s17  ;;  %p1286_p6 = scmp.lt.s32.totalorder %s1277_s17, %s1277_s17 }
  0x2b   : > { %p1280_p10 = pnand %p1278_p9, %p1686_p13  ;;  %p1287_p12 = por %p1286_p6, %p1285_p2 }
  0x2d   : > { %p1281_p1 = pneg %p1280_p10 }
  0x2f   : > { %p1288_p0 = pnand %p1287_p12, %p1281_p1 }
  0x31   : > { %1291 = shalt.err (!%p1288_p0)
}
  0x32   : > { %s1533_s26 = smov 128   ;;  %s1534_s24 = smov 8  }
  0x33   : > { %1172 = dma.hbm_to_vmem [thread:$0]  (!%p1670_p11), %s2028_s3, 512, %s1663_s29, [#allocation6], %s1533_s26, %s1533_s26, %s1534_s24  }
  0x34   : > { %s1292_s17 = scalar_lea.hbm %s2029_s4, 512 }
  0x35   : > { %p1293_p1 = scmp.ne.s32.totalorder %s2029_s4, %s1292_s17  ;;  %p1299_p10 = scmp.lt.u32.totalorder %s1292_s17, %s2029_s4 }
  0x37   : > { %p1295_p2 = pnand %p1293_p1, %p1686_p13 }
  0x39   : > { %p1296_p6 = pneg %p1295_p2 }
  0x3b   : > { %p1301_p3 = pnand %p1299_p10, %p1296_p6 }
  0x3d   : > { %1304 = shalt.err (!%p1301_p3)
}
  0x3e   : > { %s1305_s29 = scalar_lea.vmem %s1674_s13, 512  ;;  %p1313_p12 = scmp.lt.s32.totalorder %s1674_s13, %s1674_s13 }
  0x3f   : > { %p1306_p5 = scmp.ne.s32.totalorder %s1674_s13, %s1305_s29  ;;  %p1314_p0 = scmp.lt.s32.totalorder %s1305_s29, %s1305_s29 }
  0x41   : > { %p1308_p7 = pnand %p1306_p5, %p1686_p13  ;;  %p1315_p1 = por %p1314_p0, %p1313_p12 }
  0x43   : > { %p1309_p9 = pneg %p1308_p7 }
  0x45   : > { %p1316_p2 = pnand %p1315_p1, %p1309_p9 }
  0x47   : > { %1319 = shalt.err (!%p1316_p2)
}
  0x48   : > { %1175 = dma.hbm_to_vmem [thread:$0]  (!%p1670_p11), %s2029_s4, 512, %s1674_s13, [#allocation6], %s1533_s26, %s1533_s26, %s1534_s24  }
  0x49   : > { %s1320_s16 = scalar_lea.hbm %s2030_s5, 512 }
  0x4a   : > { %p1321_p6 = scmp.ne.s32.totalorder %s2030_s5, %s1320_s16  ;;  %p1327_p5 = scmp.lt.u32.totalorder %s1320_s16, %s2030_s5 }
  0x4c   : > { %p1323_p10 = pnand %p1321_p6, %p1686_p13 }
  0x4e   : > { %p1324_p3 = pneg %p1323_p10 }
  0x50   : > { %p1329_p7 = pnand %p1327_p5, %p1324_p3 }
  0x52   : > { %1332 = shalt.err (!%p1329_p7)
}
  0x53   : > { %s1333_s29 = scalar_lea.vmem %s375_s15, 512  ;;  %p1341_p1 = scmp.lt.s32.totalorder %s375_s15, %s375_s15 }
  0x54   : > { %p1334_p9 = scmp.ne.s32.totalorder %s375_s15, %s1333_s29  ;;  %p1342_p2 = scmp.lt.s32.totalorder %s1333_s29, %s1333_s29 }
  0x56   : > { %p1336_p12 = pnand %p1334_p9, %p1686_p13  ;;  %p1343_p4 = por %p1342_p2, %p1341_p1 }
  0x58   : > { %p1337_p0 = pneg %p1336_p12 }
  0x5a   : > { %p1344_p8 = pnand %p1343_p4, %p1337_p0 }
  0x5c   : > { %1347 = shalt.err (!%p1344_p8)
}
  0x5d   : > { %1178 = dma.hbm_to_vmem [thread:$0]  (!%p1670_p11), %s2030_s5, 512, %s375_s15, [#allocation9], %s1533_s26, %s1533_s26, %s1534_s24  }
  0x5e   : > { %s54_s11 = sadd.s32 1, %s1516_s19  ;;  %s45_s30 = sadd.s32 1, %s1524_s21 }
  0x5f   : > { %p61_p4 = scmp.ne.s32.totalorder %s1516_s19, %s1512_s18  ;;  %p47_p8 = scmp.ge.s32.totalorder %s45_s30, 2 }
  0x60   : > { %p62_p13 = scmp.eq.s32.totalorder %s1528_s22, 0  ;;  %p2063_p6 = scmp.eq.s32.totalorder %s1638_s23, 1 }
  0x61   : > { %p1196_p3 = scmp.lt.s32.totalorder %s1528_s22, 2  ;;  %s2092_s30 = smov (%p47_p8, %s45_s30), 0 }
  0x62   : > { %p1765_p10 = por %p2063_p6, %p61_p4  ;;  %p63_p5 = por %p62_p13, %p61_p4 }
  0x63   : > { %s397_s10 = sand.u32 1, %s1516_s19   ;;  %s49_s20 = ssub.s32 %s1524_s21, %s2092_s30 }
  0x64   : > { %p52_p7 = scmp.eq.s32.totalorder %s49_s20, 0  ;;  %s1051_s15 = sshll.u32 %s397_s10, 3 }
  0x65   : > { %s1052_s26 = sshll.u32 %s1524_s21, 7  ;;  %s2065_s0 = sld [smem:[#allocation22_spill]] }
  0x66   : > { %s1777_s24 = scalar_select %p52_p7, %s1516_s19, %s54_s11  }
  0x67   : > { %s401_s14 = scalar_lea.vmem [#allocation2], %s1051_s15  ;;  %p1788_p11 = pnand %p1196_p3, %p63_p5 }
  0x68   : > { %s409_s17 = sshll.u32 %s401_s14, 4  ;;  %s398_s13 = scalar_lea.sflag [#allocation3], %s397_s10  ;;  %s1784_s17 = int_to_ptr.vmem [resolvable:$true] %s409_s17 }
  0x69   : > { %p1350_p12 = pneg %p1788_p11 }
  0x6b   : > { %s1782_s12 = scalar_lea.hbm %s2065_s0, %s1052_s26  ;;  %s1353_s15 = scalar_lea.hbm %s2065_s0, 256 }
  0x6c   : > { %s1348_s8 = scalar_lea.hbm %s1782_s12, 128  ;;  %p1354_p2 = scmp.lt.u32.totalorder %s1782_s12, %s2065_s0 }
  0x6d   : > { %p1349_p9 = scmp.ne.s32.totalorder %s1782_s12, %s1348_s8  ;;  %p1355_p4 = scmp.lt.u32.totalorder %s1353_s15, %s1348_s8 }
  0x6e   : > { %p1357_p13 = scmp.lt.u32.totalorder %s1348_s8, %s1782_s12 }
  0x6f   : > { %p1351_p0 = pnand %p1350_p12, %p1349_p9  ;;  %p1356_p8 = por %p1355_p4, %p1354_p2 }
  0x71   : > { %p1352_p1 = pneg %p1351_p0  ;;  %p1358_p6 = por %p1357_p13, %p1356_p8 }
  0x73   : > { %p1359_p3 = pnand %p1358_p6, %p1352_p1 }
  0x75   : > { %1362 = shalt.err (!%p1359_p3)
}
  0x76   : > { %s1363_s10 = scalar_lea.vmem %s1784_s17, 128  ;;  %s1535_s28 = smov [#allocation2]  }
  0x77   : > { %p1364_p5 = scmp.ne.s32.totalorder %s1784_s17, %s1363_s10  ;;  %s1368_s14 = sshll.u32 %s1535_s28, 4  ;;  %s1369_s14 = int_to_ptr.vmem [resolvable:$false] %s1368_s14 }
  0x78   : > { %s1370_s11 = scalar_lea.vmem %s1369_s14, 256  ;;  %p1371_p0 = scmp.lt.s32.totalorder %s1784_s17, %s1369_s14 }
  0x79   : > { %p1366_p7 = pnand %p1364_p5, %p1350_p12  ;;  %p1372_p2 = scmp.lt.s32.totalorder %s1370_s11, %s1363_s10 }
  0x7b   : > { %p1367_p9 = pneg %p1366_p7  ;;  %p1373_p4 = por %p1372_p2, %p1371_p0 }
  0x7d   : > { %p1374_p8 = pnand %p1373_p4, %p1367_p9 }
  0x7f   : > { %1377 = shalt.err (!%p1374_p8)
}
  0x80   : > { %1182 = dma.hbm_to_vmem [thread:$0]  (!%p1788_p11), %s1782_s12, 128, %s1784_s17, %s398_s13  }
  0x81   : > { %p2067_p1 = scmp.ne.s32.totalorder %s2060_s27, 0 }
  0x82   : > { %s1820_s8 = sand.u32 (!%p2067_p1), 1, %s1512_s18   ;;  %p2068_p12 = scmp.ne.s32.totalorder (!%p2067_p1), %s2057_s25, 0 }
  0x83   : > { %418 = sbr.rel (%p2067_p1) target bundleno = 857 (0x359), region = 56  ;;  %s1054_s20 = sshll.u32 (!%p2067_p1), %s1820_s8, 3 }
  0x84   : > { %s421_s15 = scalar_lea.sflag (!%p2067_p1), [#allocation3], %s1820_s8  ;;  %s424_s26 = scalar_lea.vmem (!%p2067_p1), [#allocation2], %s1054_s20 }
  0x8a   : > { %1487 = dma.done.wait (%p2068_p12), %s421_s15, 128  }
  0x8b   : > { %1489 = vsyncadd (%p2068_p12), %s421_s15, 4294967168  ;;  %p2069_p13 = scmp.eq.s32.totalorder %s1638_s23, 0 }
  0x8d   : > { %1491 = dma.done.wait (%p2069_p13), [#allocation6], 1024   ;;  %p2070_p11 = pmov %p2069_p13 }
  0x8f   : > { %1493 = vsyncadd (%p2070_p11), [#allocation6], 4294966272  ;;  %p2071_p6 = pmov %p2070_p11 }
  0x91   : > { %1495 = dma.done.wait (%p2071_p6), [#allocation9], 512   ;;  %p2072_p3 = pmov %p2071_p6 }
  0x92   : > { %vm488_vm0 = vcmask 261120   ;;  %v485_v0 = vld [vmem:[%s424_s26] sm:$0xff]  ;;  %v517_v7 = vld [vmem:[#allocation5] sm:$0xff]  ;;  %v518_v8 = vld [vmem:[#allocation5 + $0x8] sm:$0xff]  ;;  %v1536_v10 = vmov 0.0|0.0   ;;  %vm1537_vm1 = vmmov 0  }
  0x93   : > { %1497 = vsyncadd (%p2072_p3), [#allocation9], 4294966784  ;;  %v489_v1 = vsel %vm488_vm0, %v485_v0, 0.0  ;;  %v601_v9 = vld [vmem:[#allocation7] sm:$0xff]  ;;  %1131 = vmatprep.subr.bf16.mxu0 %v1536_v10  ;;  %v1132_v11 = vpack.c.bf16 %v518_v8, %v517_v7  ;;  %1137 = vmatprep.subr.bf16.mxu1 %v1536_v10  ;;  %v602_v12 = vld [vmem:[#allocation7 + $0x8] sm:$0xff]  ;;  %v1538_v18 = vmov 0.0  }
  0x94   : > { %490 = vadd.xlane.f32.xlu0 %v489_v1  ;;  %v519_v13 = vld [vmem:[#allocation5 + $0x10] sm:$0xff]  ;;  %v520_v14 = vld [vmem:[#allocation5 + $0x18] sm:$0xff]  ;;  %v1138_v15 = vpack.c.bf16 %v602_v12, %v601_v9  ;;  %1106 = vmatprep.mubr.msk.f32.mxu0 %vm1537_vm1, %v1538_v18  ;;  %v682_v27 = vld [vmem:[#allocation8] sm:$0xff]  ;;  %s1058_s29 = sshll.u32 %s1820_s8, 5  ;;  %vm774_vm2 = vcmask 64512   ;;  %s1539_s11 = smov 104  }
  0x95   : > { %v603_v16 = vld [vmem:[#allocation7 + $0x10] sm:$0xff]  ;;  %v604_v17 = vld [vmem:[#allocation7 + $0x18] sm:$0xff]  ;;  %1117 = vmatprep.mubr.msk.f32.mxu1 %vm1537_vm1, %v1538_v18  ;;  %1133 = vmatpush3.bf16.msra.mxu0 %v1132_v11  ;;  %v1135_v19 = vpack.c.bf16 %v520_v14, %v519_v13  ;;  %v683_v28 = vld [vmem:[#allocation8 + $0x8] sm:$0xff]  ;;  %s1857_s14 = scalar_lea.vmem [#allocation11], %s1058_s29  ;;  %s1540_s20 = smov 120  }
  0x96   : > { %1139 = vmatpush3.bf16.msra.mxu1 %v1138_v15  ;;  %1134 = vmatprep.subr.bf16.mxu0 %v1536_v10  ;;  %v1141_v20 = vpack.c.bf16 %v604_v17, %v603_v16  ;;  %v1061_v25 = vld [vmem:[%s2026_s1] ss:$0 sm:$0xff]  ;;  %v1144_v31 = vpack.c.bf16 %v683_v28, %v682_v27  ;;  %v685_v34 = vld [vmem:[#allocation8 + $0x18] sm:$0xff]  ;;  %s1861_s15 = scalar_lea.vmem [#allocation10], %s1058_s29  ;;  %s2073_s27 = sld [smem:[#allocation23_spill]] }
  0x97   : > { %1140 = vmatprep.subr.bf16.mxu1 %v1536_v10  ;;  %v1062_v29 = vld [vmem:[%s2027_s2] ss:$0 sm:$0xff]  ;;  %s1541_s12 = smov 112   ;;  %s2074_s17 = sld [smem:[#allocation20_spill]] }
  0x98   : > { %v684_v33 = vld [vmem:[#allocation8 + $0x10] sm:$0xff]  ;;  %s1868_s13 = scalar_lea.vmem [#allocation13], %s1058_s29  ;;  %s849_s16 = sshll.u32 %s1857_s14, 4  ;;  %s1877_s16 = int_to_ptr.vmem [resolvable:$true] %s849_s16 }
  0x99   : > { %1136 = vmatpush3.bf16.msra.mxu0 %v1135_v19  ;;  %v1147_v35 = vpack.c.bf16 %v685_v34, %v684_v33  ;;  %v1063_v36 = vld [vmem:[%s2031_s6] ss:$0 sm:$0xff]  ;;  %s812_s10 = sand.u32 1, %s1638_s23   ;;  %s2075_s26 = sld [smem:[#allocation25_spill]] }
  0x9a   : > { %1142 = vmatpush3.bf16.msra.mxu1 %v1141_v20  ;;  %1143 = vmatprep.subr.bf16.mxu0 %v1536_v10  ;;  %v1065_v37 = vld [vmem:[%s2032_s7] ss:$0 sm:$0xff]  ;;  %s1891_s23 = scalar_lea.sflag [#allocation12], %s812_s10  ;;  %s1378_s25 = scalar_lea.vmem %s1877_s16, 512 }
  0x9b   : > { %p1379_p5 = scmp.ne.s32.totalorder %s1877_s16, %s1378_s25 }
  0x9c   : > { %v1067_v45 = vld [vmem:[%s2073_s27] ss:$0 sm:$0xff]  ;;  %s1542_s27 = smov [#allocation11]  }
  0x9d   : > { %s1875_s28 = sshll.u32 %s2074_s17, 9  ;;  %p1380_p7 = pnand %p1379_p5, %p1765_p10 }
  0x9f   : > { %p1381_p9 = pneg %p1380_p7 }
 0x121   : > { %v491_v2 = vpop.xlane.xlu0 %490 }
 0x122   : > { %v493_v3 = vmul.f32 0.03125, %v491_v2 }
 0x124   : > { %v494_v4 = vsub.f32 %v485_v0, %v493_v3 }
 0x126   : > { %v495_v5 = vmul.f32 %v494_v4, %v494_v4 }
 0x128   : > { %v496_v6 = vsel %vm488_vm0, %v495_v5, 0.0 }
 0x129   : > { %497 = vadd.xlane.f32.xlu0 %v496_v6 }
 0x1b6   : > { %v498_v21 = vpop.xlane.xlu0 %497 }
 0x1b7   : > { %v499_v22 = vmul.f32 0.03125, %v498_v21 }
 0x1b9   : > { %v500_v23 = vadd.f32 1e-05, %v499_v22 }
 0x1bb   : > { %1262 = vrsqrt.f32 %v500_v23 }
 0x1c5   : > { %v1263_v24 = vpop.eup %1262 }
 0x1c6   : > { %v502_v26 = vmul.f32 %v1263_v24, %v494_v4 }
 0x1c8   : > { %v509_v30 = vmul.f32 %v1061_v25, %v502_v26 }
 0x1ca   : > { %v516_v32 = vadd.f32 %v1062_v29, %v509_v30 }
 0x1cc   : > { %1107 = vmatmul.mubr.msk.f32.vlgmr.msra.gmra.mrb[0].mxu0 %vm488_vm0, %v516_v32  ;;  %1118 = vmatmul.mubr.msk.f32.vlgmr.msra.gmra.mrb[0].mxu1 %vm488_vm0, %v516_v32 }
 0x1cd   : > { %1145 = vmatpush3.bf16.msra.mxu0 %v1144_v31  ;;  %1128 = vmatprep.mubr.msk.f32.mxu0 %vm1537_vm1, %v1538_v18 }
 0x1ce   : > { %1146 = vmatprep.subr.bf16.mxu0 %v1536_v10 }
 0x1d1   : > { %1148 = vmatpush3.bf16.msra.mxu0 %v1147_v35 }
 0x1d4   : > { %1129 = vmatmul.mubr.msk.f32.vlgmr.msra.gmra.mrb[2].mxu0 %vm488_vm0, %v516_v32 }
 0x29f   : > { %v597_v38 = vpop.f32.mrb[0].mxu0  ;;  %v678_v39 = vpop.f32.mrb[0].mxu1 }
 0x2a0   : > { %v598_v40 = vadd.f32 %v1063_v36, %v597_v38  ;;  %v679_v41 = vadd.f32 %v1065_v37, %v678_v39  ;;  %v1108_v42 = vpop.f32.mrb[1].mxu0  ;;  %v1119_v43 = vpop.f32.mrb[1].mxu1 }
 0x2a2   : > { %v763_v44 = vmul.f32 0.17677669, %v598_v40  ;;  %789 = vst.msk [vmem:[%s1857_s14] sm:$0xff] %vm774_vm2, %v679_v41  ;;  %786 = vrot.lane.b32.xlu0 %v679_v41, %s1539_s11  ;;  %780 = vrot.lane.b32.xlu1 %v679_v41, %s1540_s20 }
 0x2a4   : > { %775 = vst.msk [vmem:[%s1861_s15] sm:$0xff] %vm774_vm2, %v763_v44 }
 0x2a6   : > { %783 = vrot.lane.b32.xlu1 %v679_v41, %s1541_s12 }
 0x2a7   : > { %v759_v46 = vpop.f32.mrb[2].mxu0 }
 0x2a8   : > { %v760_v47 = vadd.f32 %v1067_v45, %v759_v46  ;;  %v1130_v48 = vpop.f32.mrb[3].mxu0 }
 0x2aa   : > { %803 = vst.msk [vmem:[%s1868_s13] sm:$0xff] %vm774_vm2, %v760_v47  ;;  %765 = vrot.lane.b32.xlu1 %v763_v44, %s1540_s20 }
 0x2ae   : > { %768 = vrot.lane.b32.xlu1 %v763_v44, %s1541_s12 }
 0x2b2   : > { %771 = vrot.lane.b32.xlu1 %v763_v44, %s1539_s11 }
 0x2b6   : > { %794 = vrot.lane.b32.xlu1 %v760_v47, %s1540_s20 }
 0x2ba   : > { %797 = vrot.lane.b32.xlu1 %v760_v47, %s1541_s12  ;;  %s1382_s12 = sshll.u32 %s1542_s27, 4  ;;  %s1383_s12 = int_to_ptr.vmem [resolvable:$false] %s1382_s12 }
 0x2bb   : > { %s1384_s17 = scalar_lea.vmem %s1383_s12, 1024  ;;  %p1385_p0 = scmp.lt.s32.totalorder %s1877_s16, %s1383_s12 }
 0x2bc   : > { %p1386_p2 = scmp.lt.s32.totalorder %s1384_s17, %s1378_s25 }
 0x2be   : > { %800 = vrot.lane.b32.xlu1 %v760_v47, %s1539_s11  ;;  %s1887_s11 = scalar_lea.hbm %s2075_s26, %s1875_s28  ;;  %p1387_p4 = por %p1386_p2, %p1385_p0 }
 0x2c0   : > { %p1388_p8 = pnand %p1387_p4, %p1381_p9 }
 0x314   : > { %v787_v49 = vpop.permute.xlu0 %786  ;;  %v781_v50 = vpop.permute.xlu1 %780 }
 0x315   : > { %792 = vst.msk [vmem:[%s1857_s14 + $0x18] sm:$0xff] %vm774_vm2, %v787_v49  ;;  %790 = vst.msk [vmem:[%s1857_s14 + $0x8] sm:$0xff] %vm774_vm2, %v781_v50 }
 0x318   : > { %v784_v51 = vpop.permute.xlu1 %783 }
 0x319   : > { %791 = vst.msk [vmem:[%s1857_s14 + $0x10] sm:$0xff] %vm774_vm2, %v784_v51 }
 0x31a   : > { %1391 = shalt.err (!%p1388_p8)
}
 0x31b   : > { %s1392_s14 = scalar_lea.hbm %s1887_s11, 512  ;;  %s1396_s20 = scalar_lea.hbm %s2075_s26, 1024 }
 0x31c   : > { %p1393_p1 = scmp.ne.s32.totalorder %s1887_s11, %s1392_s14  ;;  %p1397_p11 = scmp.lt.u32.totalorder %s1887_s11, %s2075_s26 }
 0x31d   : > { %p1398_p6 = scmp.lt.u32.totalorder %s1396_s20, %s1392_s14  ;;  %p1400_p5 = scmp.lt.u32.totalorder %s1392_s14, %s1887_s11 }
 0x31e   : > { %p1394_p12 = pnand %p1393_p1, %p1765_p10 }
 0x31f   : > { %p1399_p3 = por %p1398_p6, %p1397_p11 }
 0x320   : > { %p1395_p13 = pneg %p1394_p12 }
 0x321   : > { %p1401_p7 = por %p1400_p5, %p1399_p3 }
 0x323   : > { %p1402_p9 = pnand %p1401_p7, %p1395_p13 }
 0x325   : > { %1405 = shalt.err (!%p1402_p9)
}
 0x326   : > { %s2046_s25 = smov 128   ;;  %s2048_s17 = smov 8   ;;  %v766_v52 = vpop.permute.xlu1 %765 }
 0x327   : > { %1164 = dma.vmem_to_hbm [thread:$0]  (%p1765_p10), %s1877_s16, 512, %s1887_s11, %s1891_s23, %s2046_s25, %s2046_s25, %s2048_s17  }
 0x328   : > { %776 = vst.msk [vmem:[%s1861_s15 + $0x8] sm:$0xff] %vm774_vm2, %v766_v52  ;;  %s832_s14 = sshll.u32 %s1861_s15, 4  ;;  %s2076_s20 = sld [smem:[#allocation24_spill]]  ;;  %s1923_s14 = int_to_ptr.vmem [resolvable:$true] %s832_s14 }
 0x329   : > { %s808_s16 = scalar_lea.sflag [#allocation4], %s1820_s8  ;;  %s1406_s11 = scalar_lea.vmem %s1923_s14, 512 }
 0x32a   : > { %v769_v53 = vpop.permute.xlu1 %768  ;;  %p1407_p0 = scmp.ne.s32.totalorder %s1923_s14, %s1406_s11  ;;  %s1545_s25 = smov [#allocation10]  }
 0x32b   : > { %777 = vst.msk [vmem:[%s1861_s15 + $0x10] sm:$0xff] %vm774_vm2, %v769_v53  ;;  %s1410_s17 = sshll.u32 %s1545_s25, 4  ;;  %s1411_s17 = int_to_ptr.vmem [resolvable:$false] %s1410_s17 }
 0x32c   : > { %p1408_p2 = pnand %p1407_p0, %p1765_p10  ;;  %s1412_s0 = scalar_lea.vmem %s1411_s17, 1024 }
 0x32d   : > { %p1413_p8 = scmp.lt.s32.totalorder %s1923_s14, %s1411_s17  ;;  %p1414_p1 = scmp.lt.s32.totalorder %s1412_s0, %s1406_s11 }
 0x32e   : > { %s2077_s27 = smov %s2076_s20  ;;  %s1929_s12 = scalar_lea.hbm %s2076_s20, %s1875_s28  ;;  %v772_v54 = vpop.permute.xlu1 %771 }
 0x32f   : > { %778 = vst.msk [vmem:[%s1861_s15 + $0x18] sm:$0xff] %vm774_vm2, %v772_v54  ;;  %p1409_p4 = pneg %p1408_p2  ;;  %p1415_p12 = por %p1414_p1, %p1413_p8 }
 0x331   : > { %p1416_p13 = pnand %p1415_p12, %p1409_p4 }
 0x333   : > { %1419 = shalt.err (!%p1416_p13)
}
 0x334   : > { %s1420_s15 = scalar_lea.hbm %s1929_s12, 512  ;;  %s1424_s25 = scalar_lea.hbm %s2077_s27, 1024 }
 0x335   : > { %p1421_p11 = scmp.ne.s32.totalorder %s1929_s12, %s1420_s15  ;;  %p1425_p5 = scmp.lt.u32.totalorder %s1929_s12, %s2077_s27 }
 0x336   : > { %p1426_p7 = scmp.lt.u32.totalorder %s1424_s25, %s1420_s15  ;;  %p1428_p0 = scmp.lt.u32.totalorder %s1420_s15, %s1929_s12 }
 0x337   : > { %p1422_p6 = pnand %p1421_p11, %p1765_p10 }
 0x338   : > { %p1427_p9 = por %p1426_p7, %p1425_p5 }
 0x339   : > { %p1423_p3 = pneg %p1422_p6 }
 0x33a   : > { %p1429_p2 = por %p1428_p0, %p1427_p9 }
 0x33c   : > { %p1430_p4 = pnand %p1429_p2, %p1423_p3 }
 0x33e   : > { %1433 = shalt.err (!%p1430_p4)
}
 0x33f   : > { %s2078_s0 = smov 8   ;;  %s2079_s11 = smov 128   ;;  %v795_v55 = vpop.permute.xlu1 %794 }
 0x340   : > { %1163 = dma.vmem_to_hbm [thread:$0]  (%p1765_p10), %s1923_s14, 512, %s1929_s12, %s808_s16, %s2079_s11, %s2079_s11, %s2078_s0  }
 0x341   : > { %804 = vst.msk [vmem:[%s1868_s13 + $0x8] sm:$0xff] %vm774_vm2, %v795_v55  ;;  %s866_s15 = sshll.u32 %s1868_s13, 4  ;;  %s2080_s29 = sld [smem:[#allocation26_spill]]  ;;  %s1965_s15 = int_to_ptr.vmem [resolvable:$true] %s866_s15 }
 0x342   : > { %s1434_s14 = scalar_lea.vmem %s1965_s15, 512  ;;  %s1546_s12 = smov [#allocation13]  }
 0x343   : > { %v798_v56 = vpop.permute.xlu1 %797  ;;  %p1435_p8 = scmp.ne.s32.totalorder %s1965_s15, %s1434_s14  ;;  %s1438_s16 = sshll.u32 %s1546_s12, 4  ;;  %s1439_s16 = int_to_ptr.vmem [resolvable:$false] %s1438_s16 }
 0x344   : > { %805 = vst.msk [vmem:[%s1868_s13 + $0x10] sm:$0xff] %vm774_vm2, %v798_v56  ;;  %s1440_s20 = scalar_lea.vmem %s1439_s16, 1024  ;;  %p1441_p13 = scmp.lt.s32.totalorder %s1965_s15, %s1439_s16 }
 0x345   : > { %p1436_p1 = pnand %p1435_p8, %p1765_p10  ;;  %p1442_p11 = scmp.lt.s32.totalorder %s1440_s20, %s1434_s14 }
 0x347   : > { %s1971_s25 = scalar_lea.hbm %s2080_s29, %s1875_s28  ;;  %v801_v57 = vpop.permute.xlu1 %800  ;;  %p1437_p12 = pneg %p1436_p1 }
 0x348   : > { %806 = vst.msk [vmem:[%s1868_s13 + $0x18] sm:$0xff] %vm774_vm2, %v801_v57  ;;  %p1443_p6 = por %p1442_p11, %p1441_p13 }
 0x34a   : > { %p1444_p3 = pnand %p1443_p6, %p1437_p12 }
 0x34c   : > { %1447 = shalt.err (!%p1444_p3)
}
 0x34d   : > { %s1448_s13 = scalar_lea.hbm %s1971_s25, 512  ;;  %s1452_s10 = scalar_lea.hbm %s2080_s29, 1024 }
 0x34e   : > { %p1449_p5 = scmp.ne.s32.totalorder %s1971_s25, %s1448_s13  ;;  %p1453_p0 = scmp.lt.u32.totalorder %s1971_s25, %s2080_s29 }
 0x34f   : > { %p1454_p2 = scmp.lt.u32.totalorder %s1452_s10, %s1448_s13  ;;  %p1456_p8 = scmp.lt.u32.totalorder %s1448_s13, %s1971_s25 }
 0x350   : > { %p1450_p7 = pnand %p1449_p5, %p1765_p10 }
 0x351   : > { %p1455_p4 = por %p1454_p2, %p1453_p0 }
 0x352   : > { %p1451_p9 = pneg %p1450_p7 }
 0x353   : > { %p1457_p1 = por %p1456_p8, %p1455_p4 }
 0x355   : > { %p1458_p12 = pnand %p1457_p1, %p1451_p9 }
 0x357   : > { %1461 = shalt.err (!%p1458_p12)
}
 0x358   : > { %1165 = dma.vmem_to_hbm [thread:$0]  (%p1765_p10), %s1965_s15, 512, %s1971_s25, %s1891_s23, %s2079_s11, %s2079_s11, %s2078_s0  }
 0x359 PF: > { %s2081_s14 = sld [smem:[#allocation19_spill]]  ;;  %s2082_s16 = sld [smem:[#allocation21_spill]] }
 0x35a   : > { %p2084_p11 = scmp.ge.s32.totalorder %s1528_s22, 2 }
 0x35f   : > { %s881_s20 = sand.u32 1, %s2081_s14   ;;  %p2083_p13 = scmp.ne.s32.totalorder %s2082_s16, 0 }
 0x360   : > { %s882_s13 = scalar_lea.sflag [#allocation4], %s881_s20 }
 0x361   : > { %p1184_p6 = pnand %p2084_p11, %p2083_p13 }
 0x363   : > { %1499 = dma.done.wait (!%p1184_p6), %s882_s13, 512  }
 0x364   : > { %1501 = vsyncadd (!%p1184_p6), %s882_s13, 4294966784  ;;  %s2085_s9 = sadd.s32 4294967294, %s1528_s22  }
 0x365   : > { %s890_s28 = sand.u32 1, %s2085_s9  }
 0x366   : > { %s891_s17 = scalar_lea.sflag [#allocation12], %s890_s28 }
 0x367   : > { %1503 = dma.done.wait (!%p1184_p6), %s891_s17, 1024  }
 0x368   : > { %1505 = vsyncadd (!%p1184_p6), %s891_s17, 4294966272  ;;  %s33_s22 = sadd.s32 1, %s1528_s22   ;;  %s2086_s17 = smov %s1512_s18 }
 0x369   : > { %p30_p10 = scmp.ge.s32.totalorder %s33_s22, 4   ;;  %s2087_s18 = smov %s1516_s19 }
 0x36a   : > { %s2088_s19 = smov %s1777_s24  ;;  %s2089_s20 = smov %s1524_s21 }
 0x36b   : > { %s2090_s21 = smov %s2092_s30  ;;  %32 = sbr.rel (!%p30_p10) target bundleno = 16 (0x10), region = 145 }
 0x372   :  { %905 = vsyncpa [#allocation3], 1 }
 0x373   :  { %907 = vsyncpa [#allocation3 + $0x1], 1 }
 0x374   :  { %908 = vsyncpa [#allocation6], 1 }
 0x375   :  { %909 = vsyncpa [#allocation9], 1 }
 0x376   :  { %910 = vsyncpa [#allocation4], 1 }
 0x377   :  { %912 = vsyncpa [#allocation4 + $0x1], 1 }
 0x378   :  { %913 = vsyncpa [#allocation12], 1 }
 0x379   :  { %915 = vsyncpa [#allocation12 + $0x1], 1 }

</bundles_post_ra>
